<compile_context>
chip_gen: v7x
topology: tpu7x:2x2x1
jax: 0.10.0
libtpu: 0.0.40
codegen_flags: <defaults>
</compile_context>

<pallas_src>
import jax
import jax.numpy as jnp
from jax import lax
from jax.experimental import pallas as pl
from jax.experimental.pallas import tpu as pltpu

EPS = 1e-8            # safe_norm epsilon (norm = sqrt(sum(x^2) + eps))
_LANES = 128          # lane width of a plane tile (full vreg width)
_MAX_TILE_ROWS = 1024 # (2, 1024, 128) f32 = 1 MiB per operand block
_MIN_TILE_ROWS = 8
_TARGET_GRID = 4      # keep >= 4 grid steps so both v7x cores stay busy


def _geodesic_merge_kernel(p_ref, q_ref, o_ref):
    """One (2, tile_rows, LANES) block: plane 0 = x coords, plane 1 = y."""
    px = p_ref[0].astype(jnp.float32)
    py = p_ref[1].astype(jnp.float32)
    qx = q_ref[0].astype(jnp.float32)
    qy = q_ref[1].astype(jnp.float32)

    # Squared norms of the raw children (per point, no duplication).
    pn2 = px * px + py * py
    qn2 = qx * qx + qy * qy
    pgt = pn2 > qn2                     # same decision as p_norm > q_norm
    qgt = qn2 > pn2

    # Shrink the longer child onto the radius of the shorter one.
    # scale = q_norm/p_norm (resp. p_norm/q_norm) via EUP sqrt * rsqrt.
    min2 = jnp.minimum(pn2, qn2) + EPS
    max2 = jnp.maximum(pn2, qn2) + EPS
    scale = jnp.sqrt(min2) * lax.rsqrt(max2)
    scale2 = scale * scale

    px = jnp.where(pgt, px * scale, px)
    py = jnp.where(pgt, py * scale, py)
    qx = jnp.where(qgt, qx * scale, qx)
    qy = jnp.where(qgt, qy * scale, qy)

    # Post-shrink squared norms, analytically (reference recomputes p.p).
    p_dot_p = jnp.where(pgt, pn2 * scale2, pn2)
    q_dot_q = jnp.where(qgt, qn2 * scale2, qn2)

    rx = (px + qx) * 0.5
    ry = (py + qy) * 0.5
    dx = px - qx
    dy = py - qy

    # n = (-dy, dx); |n|^2 == |d|^2.
    n2 = dx * dx + dy * dy
    inv_n = lax.rsqrt(n2 + EPS)
    nhx = -(dy * inv_n)
    nhy = dx * inv_n
    nhat2 = n2 * (inv_n * inv_n)        # |nhat|^2

    sum_pq = p_dot_p + q_dot_q
    p_dot_q = (sum_pq - n2) * 0.5
    numer = 1.0 - p_dot_q               # == p.p - 2 p.r + 1
    p_dot_nhat = px * nhx + py * nhy

    ok = p_dot_nhat != 0.0
    denom = jnp.where(ok, p_dot_nhat, jnp.float32(1.0))
    alpha = numer / (2.0 * denom)

    sx = rx + alpha * nhx
    sy = ry + alpha * nhy

    quarter_n2 = 0.25 * n2
    a2nh2 = (alpha * alpha) * nhat2
    sp2 = quarter_n2 + a2nh2                       # |s - p|^2 (d.n == 0)
    r2 = 0.5 * sum_pq - quarter_n2                 # parallelogram law
    s2 = r2 + 2.0 * alpha * p_dot_nhat + a2nh2     # r.nhat == p.nhat
    s2 = jnp.maximum(s2, 0.0)                      # guard fp cancellation

    f = 1.0 - jnp.sqrt(sp2 + EPS) * lax.rsqrt(s2 + EPS)

    mx = jnp.where(ok, sx * f, rx)
    my = jnp.where(ok, sy * f, ry)
    o_ref[0] = mx.astype(o_ref.dtype)
    o_ref[1] = my.astype(o_ref.dtype)


def _round_up(x, m):
    return ((x + m - 1) // m) * m


def _choose_tiling(V):
    """rows (per plane, multiple of 8), tile_rows, grid steps, padded rows."""
    rows = _round_up(max(-(-V // _LANES), 1), 8)
    target = max(_TARGET_GRID, -(-rows // _MAX_TILE_ROWS))
    tile_rows = min(_MAX_TILE_ROWS,
                    max(_MIN_TILE_ROWS, _round_up(-(-rows // target), 8)))
    num_blocks = -(-rows // tile_rows)
    padded_rows = num_blocks * tile_rows
    return tile_rows, num_blocks, padded_rows


def hyperbolic_geodesic_merge(children1_VxD, children2_VxD):
    """Pallas-backed HyperbolicGeodesicMergeEncoder.forward (D must be 2)."""
    V, D = children1_VxD.shape
    assert D == 2
    assert children2_VxD.shape == (V, D)
    dtype = children1_VxD.dtype

    tile_rows, num_blocks, padded_rows = _choose_tiling(V)
    plane_len = padded_rows * _LANES

    def to_planes(c):
        # (V, 2) -> (2, padded_rows, LANES); transpose+pad+reshape fuse into
        # a single XLA pass (same cost as the pad pass generic V needs anyway).
        t = c.T
        if plane_len != V:
            t = jnp.pad(t, ((0, 0), (0, plane_len - V)))
        return t.reshape(2, padded_rows, _LANES)

    p = to_planes(children1_VxD)
    q = to_planes(children2_VxD)

    spec = pl.BlockSpec((2, tile_rows, _LANES), lambda i: (0, i, 0))
    out = pl.pallas_call(
        _geodesic_merge_kernel,
        out_shape=jax.ShapeDtypeStruct((2, padded_rows, _LANES), dtype),
        grid=(num_blocks,),
        in_specs=[spec, spec],
        out_specs=spec,
        compiler_params=pltpu.CompilerParams(
            dimension_semantics=("parallel",),
            vmem_limit_bytes=32 * 1024 * 1024,
        ),
    )(p, q)

    # Re-interleave the two planes back into (V, 2); one fused slice+transpose.
    m = out.reshape(2, plane_len)[:, :V].T
    return m


def _reference(p, q):
    """Pure-JAX reference mirroring the PyTorch forward op-for-op."""
    def safe_norm(x):
        return jnp.sqrt(jnp.sum(x * x, axis=1, keepdims=True) + EPS)

    p = p.astype(jnp.float32)
    q = q.astype(jnp.float32)
    p_norm = safe_norm(p)
    q_norm = safe_norm(q)
    p = jnp.where(p_norm > q_norm, p * q_norm / p_norm, p)
    q = jnp.where(q_norm > p_norm, q * p_norm / q_norm, q)
    r = (p + q) / 2
    diff = p - q
    n = jnp.stack([-diff[:, 1], diff[:, 0]], axis=1)
    nhat = n / safe_norm(n)
    p_dot_p = jnp.sum(p * p, axis=1)
    p_dot_r = jnp.sum(p * r, axis=1)
    p_dot_nhat = jnp.sum(p * nhat, axis=1)
    ok = p_dot_nhat != 0
    p_dot_nhat = jnp.where(ok, p_dot_nhat, jnp.ones_like(p_dot_nhat))
    alpha = (p_dot_p - 2 * p_dot_r + 1) / (2 * p_dot_nhat)
    s = r + alpha[:, None] * nhat
    s_minus_p_norm = safe_norm(s - p)
    s_norm = safe_norm(s)
    m = s * (1 - s_minus_p_norm / s_norm)
    m = jnp.where(ok[:, None], m, r)
    return m


if __name__ == "__main__":
    # HyperbolicGeodesicMergeEncoder has no learnable parameters (D == 2).
    # Children sampled inside the Poincare disk with bounded radius and a
    # minimum angular separation so the geodesic problem is well conditioned.
    def make_children(key, V):
        k1, k2, k3, k4 = jax.random.split(key, 4)
        r1 = jax.random.uniform(k1, (V, 1), minval=0.25, maxval=0.8)
        r2 = jax.random.uniform(k2, (V, 1), minval=0.25, maxval=0.8)
        a1 = jax.random.uniform(k3, (V, 1), minval=0.0, maxval=2.0 * jnp.pi)
        sep = jax.random.uniform(k4, (V, 1), minval=0.6, maxval=jnp.pi - 0.6)
        a2 = a1 + sep
        c1 = jnp.concatenate([r1 * jnp.cos(a1), r1 * jnp.sin(a1)], axis=1)
        c2 = jnp.concatenate([r2 * jnp.cos(a2), r2 * jnp.sin(a2)], axis=1)
        return c1.astype(jnp.float32), c2.astype(jnp.float32)

    merge_fn = jax.jit(hyperbolic_geodesic_merge)
    key = jax.random.PRNGKey(0)
    k_small, k_big = jax.random.split(key)

    # Tiny case: single minimal (2, 8, 128) block, heavy padding path.
    V_small = 8
    c1, c2 = make_children(k_small, V_small)
    out = jax.block_until_ready(merge_fn(c1, c2))
    ref = _reference(c1, c2)
    assert out.shape == (V_small, 2)
    assert jnp.allclose(out, ref, atol=1e-4, rtol=1e-4)

    # Larger case: multi-step parallel grid (>= 4 blocks) plus ragged padding.
    V_big = 66_000
    c1, c2 = make_children(k_big, V_big)
    out = jax.block_until_ready(merge_fn(c1, c2))
    ref = _reference(c1, c2)
    assert out.shape == (V_big, 2)
    assert jnp.allclose(out, ref, atol=1e-4, rtol=1e-4)

    print("KERNEL_OK")
</pallas_src>

<mosaic_0001>
module attributes {stable_mosaic.version = 11 : i64} {
  func.func @_geodesic_merge_kernel(%arg0: i32, %arg1: memref<2x8x128xf32, #tpu.memory_space<vmem>>, %arg2: memref<2x8x128xf32, #tpu.memory_space<vmem>>, %arg3: memref<2x8x128xf32, #tpu.memory_space<vmem>>) attributes {dimension_semantics = [#tpu.dimension_semantics<parallel>], iteration_bounds = array<i64: 1>, scalar_prefetch = 0 : i64, scratch_operands = 0 : i64, tpu.core_type = #tpu.core_type<tc>, window_params = [{transform_indices = @transform_0, window_bounds = array<i64: 2, 8, 128>}, {transform_indices = @transform_1, window_bounds = array<i64: 2, 8, 128>}, {transform_indices = @transform_2, window_bounds = array<i64: 2, 8, 128>}]} {
    %c0 = arith.constant 0 : index
    %c0_0 = arith.constant 0 : index
    %c0_1 = arith.constant 0 : index
    %0 = vector.load %arg1[%c0, %c0_0, %c0_1] : memref<2x8x128xf32, #tpu.memory_space<vmem>>, vector<1x8x128xf32>
    %1 = vector.shape_cast %0 : vector<1x8x128xf32> to vector<8x128xf32>
    %c1 = arith.constant 1 : index
    %c0_2 = arith.constant 0 : index
    %c0_3 = arith.constant 0 : index
    %2 = vector.load %arg1[%c1, %c0_2, %c0_3] : memref<2x8x128xf32, #tpu.memory_space<vmem>>, vector<1x8x128xf32>
    %3 = vector.shape_cast %2 : vector<1x8x128xf32> to vector<8x128xf32>
    %c0_4 = arith.constant 0 : index
    %c0_5 = arith.constant 0 : index
    %c0_6 = arith.constant 0 : index
    %4 = vector.load %arg2[%c0_4, %c0_5, %c0_6] : memref<2x8x128xf32, #tpu.memory_space<vmem>>, vector<1x8x128xf32>
    %5 = vector.shape_cast %4 : vector<1x8x128xf32> to vector<8x128xf32>
    %c1_7 = arith.constant 1 : index
    %c0_8 = arith.constant 0 : index
    %c0_9 = arith.constant 0 : index
    %6 = vector.load %arg2[%c1_7, %c0_8, %c0_9] : memref<2x8x128xf32, #tpu.memory_space<vmem>>, vector<1x8x128xf32>
    %7 = vector.shape_cast %6 : vector<1x8x128xf32> to vector<8x128xf32>
    %8 = arith.mulf %1, %1 : vector<8x128xf32>
    %9 = arith.mulf %3, %3 : vector<8x128xf32>
    %10 = arith.addf %8, %9 : vector<8x128xf32>
    %11 = arith.mulf %5, %5 : vector<8x128xf32>
    %12 = arith.mulf %7, %7 : vector<8x128xf32>
    %13 = arith.addf %11, %12 : vector<8x128xf32>
    %14 = arith.cmpf ogt, %10, %13 : vector<8x128xf32>
    %15 = arith.cmpf ogt, %13, %10 : vector<8x128xf32>
    %16 = arith.minimumf %10, %13 : vector<8x128xf32>
    %cst = arith.constant 9.99999993E-9 : f32
    %17 = vector.broadcast %cst : f32 to vector<8x128xf32>
    %18 = arith.addf %16, %17 : vector<8x128xf32>
    %19 = arith.maximumf %10, %13 : vector<8x128xf32>
    %cst_10 = arith.constant 9.99999993E-9 : f32
    %20 = vector.broadcast %cst_10 : f32 to vector<8x128xf32>
    %21 = arith.addf %19, %20 : vector<8x128xf32>
    %22 = math.sqrt %18 : vector<8x128xf32>
    %23 = math.rsqrt %21 : vector<8x128xf32>
    %24 = arith.mulf %22, %23 : vector<8x128xf32>
    %25 = arith.mulf %24, %24 : vector<8x128xf32>
    %26 = arith.mulf %1, %24 : vector<8x128xf32>
    %27 = arith.select %14, %26, %1 : vector<8x128xi1>, vector<8x128xf32>
    %28 = arith.mulf %3, %24 : vector<8x128xf32>
    %29 = arith.select %14, %28, %3 : vector<8x128xi1>, vector<8x128xf32>
    %30 = arith.mulf %5, %24 : vector<8x128xf32>
    %31 = arith.select %15, %30, %5 : vector<8x128xi1>, vector<8x128xf32>
    %32 = arith.mulf %7, %24 : vector<8x128xf32>
    %33 = arith.select %15, %32, %7 : vector<8x128xi1>, vector<8x128xf32>
    %34 = arith.mulf %10, %25 : vector<8x128xf32>
    %35 = arith.select %14, %34, %10 : vector<8x128xi1>, vector<8x128xf32>
    %36 = arith.mulf %13, %25 : vector<8x128xf32>
    %37 = arith.select %15, %36, %13 : vector<8x128xi1>, vector<8x128xf32>
    %38 = arith.addf %27, %31 : vector<8x128xf32>
    %cst_11 = arith.constant 5.000000e-01 : f32
    %39 = vector.broadcast %cst_11 : f32 to vector<8x128xf32>
    %40 = arith.mulf %38, %39 : vector<8x128xf32>
    %41 = arith.addf %29, %33 : vector<8x128xf32>
    %cst_12 = arith.constant 5.000000e-01 : f32
    %42 = vector.broadcast %cst_12 : f32 to vector<8x128xf32>
    %43 = arith.mulf %41, %42 : vector<8x128xf32>
    %44 = arith.subf %27, %31 : vector<8x128xf32>
    %45 = arith.subf %29, %33 : vector<8x128xf32>
    %46 = arith.mulf %44, %44 : vector<8x128xf32>
    %47 = arith.mulf %45, %45 : vector<8x128xf32>
    %48 = arith.addf %46, %47 : vector<8x128xf32>
    %cst_13 = arith.constant 9.99999993E-9 : f32
    %49 = vector.broadcast %cst_13 : f32 to vector<8x128xf32>
    %50 = arith.addf %48, %49 : vector<8x128xf32>
    %51 = math.rsqrt %50 : vector<8x128xf32>
    %52 = arith.mulf %45, %51 : vector<8x128xf32>
    %cst_14 = arith.constant 0.000000e+00 : f32
    %53 = vector.broadcast %cst_14 : f32 to vector<8x128xf32>
    %54 = arith.subf %53, %52 : vector<8x128xf32>
    %55 = arith.mulf %44, %51 : vector<8x128xf32>
    %56 = arith.mulf %51, %51 : vector<8x128xf32>
    %57 = arith.mulf %48, %56 : vector<8x128xf32>
    %58 = arith.addf %35, %37 : vector<8x128xf32>
    %59 = arith.subf %58, %48 : vector<8x128xf32>
    %cst_15 = arith.constant 5.000000e-01 : f32
    %60 = vector.broadcast %cst_15 : f32 to vector<8x128xf32>
    %61 = arith.mulf %59, %60 : vector<8x128xf32>
    %cst_16 = arith.constant 1.000000e+00 : f32
    %62 = vector.broadcast %cst_16 : f32 to vector<8x128xf32>
    %63 = arith.subf %62, %61 : vector<8x128xf32>
    %64 = arith.mulf %27, %54 : vector<8x128xf32>
    %65 = arith.mulf %29, %55 : vector<8x128xf32>
    %66 = arith.addf %64, %65 : vector<8x128xf32>
    %cst_17 = arith.constant 0.000000e+00 : f32
    %67 = vector.broadcast %cst_17 : f32 to vector<8x128xf32>
    %68 = arith.cmpf one, %66, %67 : vector<8x128xf32>
    %cst_18 = arith.constant 1.000000e+00 : f32
    %69 = vector.broadcast %cst_18 : f32 to vector<8x128xf32>
    %70 = arith.select %68, %66, %69 : vector<8x128xi1>, vector<8x128xf32>
    %cst_19 = arith.constant 2.000000e+00 : f32
    %71 = vector.broadcast %cst_19 : f32 to vector<8x128xf32>
    %72 = arith.mulf %71, %70 : vector<8x128xf32>
    %73 = arith.divf %63, %72 : vector<8x128xf32>
    %74 = arith.mulf %73, %54 : vector<8x128xf32>
    %75 = arith.addf %40, %74 : vector<8x128xf32>
    %76 = arith.mulf %73, %55 : vector<8x128xf32>
    %77 = arith.addf %43, %76 : vector<8x128xf32>
    %cst_20 = arith.constant 2.500000e-01 : f32
    %78 = vector.broadcast %cst_20 : f32 to vector<8x128xf32>
    %79 = arith.mulf %78, %48 : vector<8x128xf32>
    %80 = arith.mulf %73, %73 : vector<8x128xf32>
    %81 = arith.mulf %80, %57 : vector<8x128xf32>
    %82 = arith.addf %79, %81 : vector<8x128xf32>
    %cst_21 = arith.constant 5.000000e-01 : f32
    %83 = vector.broadcast %cst_21 : f32 to vector<8x128xf32>
    %84 = arith.mulf %83, %58 : vector<8x128xf32>
    %85 = arith.subf %84, %79 : vector<8x128xf32>
    %cst_22 = arith.constant 2.000000e+00 : f32
    %86 = vector.broadcast %cst_22 : f32 to vector<8x128xf32>
    %87 = arith.mulf %86, %73 : vector<8x128xf32>
    %88 = arith.mulf %87, %66 : vector<8x128xf32>
    %89 = arith.addf %85, %88 : vector<8x128xf32>
    %90 = arith.addf %89, %81 : vector<8x128xf32>
    %cst_23 = arith.constant 0.000000e+00 : f32
    %91 = vector.broadcast %cst_23 : f32 to vector<8x128xf32>
    %92 = arith.maximumf %90, %91 : vector<8x128xf32>
    %cst_24 = arith.constant 9.99999993E-9 : f32
    %93 = vector.broadcast %cst_24 : f32 to vector<8x128xf32>
    %94 = arith.addf %82, %93 : vector<8x128xf32>
    %95 = math.sqrt %94 : vector<8x128xf32>
    %cst_25 = arith.constant 9.99999993E-9 : f32
    %96 = vector.broadcast %cst_25 : f32 to vector<8x128xf32>
    %97 = arith.addf %92, %96 : vector<8x128xf32>
    %98 = math.rsqrt %97 : vector<8x128xf32>
    %99 = arith.mulf %95, %98 : vector<8x128xf32>
    %cst_26 = arith.constant 1.000000e+00 : f32
    %100 = vector.broadcast %cst_26 : f32 to vector<8x128xf32>
    %101 = arith.subf %100, %99 : vector<8x128xf32>
    %102 = arith.mulf %75, %101 : vector<8x128xf32>
    %103 = arith.select %68, %102, %40 : vector<8x128xi1>, vector<8x128xf32>
    %104 = arith.mulf %77, %101 : vector<8x128xf32>
    %105 = arith.select %68, %104, %43 : vector<8x128xi1>, vector<8x128xf32>
    %c0_27 = arith.constant 0 : index
    %c0_28 = arith.constant 0 : index
    %c0_29 = arith.constant 0 : index
    %106 = vector.load %arg3[%c0_27, %c0_28, %c0_29] : memref<2x8x128xf32, #tpu.memory_space<vmem>>, vector<1x8x128xf32>
    %107 = vector.shape_cast %106 : vector<1x8x128xf32> to vector<8x128xf32>
    %108 = vector.shape_cast %103 : vector<8x128xf32> to vector<1x8x128xf32>
    tpu.vector_store %arg3[%c0_27, %c0_28, %c0_29], %108 {strides = array<i32>} : memref<2x8x128xf32, #tpu.memory_space<vmem>>, vector<1x8x128xf32>,
    %c1_30 = arith.constant 1 : index
    %c0_31 = arith.constant 0 : index
    %c0_32 = arith.constant 0 : index
    %109 = vector.load %arg3[%c1_30, %c0_31, %c0_32] : memref<2x8x128xf32, #tpu.memory_space<vmem>>, vector<1x8x128xf32>
    %110 = vector.shape_cast %109 : vector<1x8x128xf32> to vector<8x128xf32>
    %111 = vector.shape_cast %105 : vector<8x128xf32> to vector<1x8x128xf32>
    tpu.vector_store %arg3[%c1_30, %c0_31, %c0_32], %111 {strides = array<i32>} : memref<2x8x128xf32, #tpu.memory_space<vmem>>, vector<1x8x128xf32>,
    return
  }
  func.func @transform_0(%arg0: i32) -> (i32, i32, i32) {
    %c0_i32 = arith.constant 0 : i32
    %c0_i32_0 = arith.constant 0 : i32
    %c0_i32_1 = arith.constant 0 : i32
    return %c0_i32, %arg0, %c0_i32_0 : i32, i32, i32
  }
  func.func @transform_1(%arg0: i32) -> (i32, i32, i32) {
    %c0_i32 = arith.constant 0 : i32
    %c0_i32_0 = arith.constant 0 : i32
    %c0_i32_1 = arith.constant 0 : i32
    return %c0_i32, %arg0, %c0_i32_0 : i32, i32, i32
  }
  func.func @transform_2(%arg0: i32) -> (i32, i32, i32) {
    %c0_i32 = arith.constant 0 : i32
    %c0_i32_0 = arith.constant 0 : i32
    %c0_i32_1 = arith.constant 0 : i32
    return %c0_i32, %arg0, %c0_i32_0 : i32, i32, i32
  }
}

</mosaic_0001>

<bundles_post_ra>
// kernel: hyperbolic_geodesic_merge.1
= control target key start
LH: loop header
LB: loop body
LE: loop exit
PB: predicated region body
PF: predicated region fallthrough
CT: control target
= control target key end

     0   :  { %s174_s0 = inlined_call_operand.vmem [shape: f32[2,8,128], index: 0, kind: input, shape index: {}]   ;;  %s175_s1 = inlined_call_operand.vmem [shape: f32[2,8,128], index: 1, kind: input, shape index: {}]   ;;  %s176_s2 = inlined_call_operand.vmem [shape: f32[2,8,128], index: 2, kind: output, shape index: {}]  }
   0x1   :  { %v11_v0 = vld [vmem:[%s174_s0] sm:$0xff]  ;;  %v117_v1 = vld [vmem:[%s174_s0 + $0x8] sm:$0xff] }
   0x2   :  { %v14_v2 = vld [vmem:[%s175_s1] sm:$0xff]  ;;  %v118_v3 = vld [vmem:[%s175_s1 + $0x8] sm:$0xff]  ;;  %v17_v4 = vmul.f32 %v11_v0, %v11_v0  ;;  %v18_v5 = vmul.f32 %v117_v1, %v117_v1 }
   0x3   :  { %v20_v6 = vmul.f32 %v14_v2, %v14_v2  ;;  %v21_v7 = vmul.f32 %v118_v3, %v118_v3 }
   0x4   :  { %v19_v8 = vadd.f32 %v18_v5, %v17_v4 }
   0x5   :  { %v22_v9 = vadd.f32 %v21_v7, %v20_v6 }
   0x7   :  { %v25_v10 = vmin.f32 %v19_v8, %v22_v9  ;;  %v27_v11 = vmax.f32 %v19_v8, %v22_v9  ;;  %vm23_vm2 = vcmp.gt.f32.partialorder %v19_v8, %v22_v9  ;;  %vm24_vm3 = vcmp.gt.f32.partialorder %v22_v9, %v19_v8 }
   0x9   :  { %v26_v12 = vadd.f32 1e-08, %v25_v10  ;;  %v28_v13 = vadd.f32 1e-08, %v27_v11 }
   0xb   :  { %120 = vrsqrt.f32 %v26_v12  ;;  %vm31_vm0 = vcmp.eq.f32.partialorder %v26_v12, inf  ;;  %v34_v15 = vand.u32 2147483648, %v26_v12  ;;  %vm33_vm1 = vcmp.eq.f32.partialorder %v26_v12, 0.0 }
   0xc   :  { %122 = vrsqrt.f32 %v28_v13 }
  0x15   :  { %v121_v14 = vpop.eup %120 }
  0x16   :  { %v30_v16 = vmul.f32 %v121_v14, %v26_v12  ;;  %v123_v17 = vpop.eup %122 }
  0x18   :  { %v32_v18 = vsel %vm31_vm0, %v26_v12, %v30_v16 }
  0x19   :  { %v35_v19 = vsel %vm33_vm1, %v34_v15, %v32_v18 }
  0x1a   :  { %v37_v20 = vmul.f32 %v123_v17, %v35_v19 }
  0x1c   :  { %v39_v21 = vmul.f32 %v37_v20, %v11_v0  ;;  %v41_v22 = vmul.f32 %v117_v1, %v37_v20  ;;  %v43_v23 = vmul.f32 %v37_v20, %v14_v2  ;;  %v45_v24 = vmul.f32 %v118_v3, %v37_v20 }
  0x1d   :  { %v38_v37 = vmul.f32 %v37_v20, %v37_v20 }
  0x1e   :  { %v40_v25 = vsel %vm23_vm2, %v39_v21, %v11_v0  ;;  %v42_v26 = vsel %vm23_vm2, %v41_v22, %v117_v1  ;;  %v44_v27 = vsel %vm24_vm3, %v43_v23, %v14_v2  ;;  %v46_v28 = vsel %vm24_vm3, %v45_v24, %v118_v3 }
  0x1f   :  { %v51_v29 = vadd.f32 %v44_v27, %v40_v25  ;;  %v55_v30 = vsub.f32 %v40_v25, %v44_v27  ;;  %v56_v31 = vsub.f32 %v42_v26, %v46_v28  ;;  %v53_v32 = vadd.f32 %v46_v28, %v42_v26 }
  0x20   :  { %v47_v39 = vmul.f32 %v38_v37, %v19_v8  ;;  %v49_v40 = vmul.f32 %v38_v37, %v22_v9 }
  0x21   :  { %v57_v33 = vmul.f32 %v55_v30, %v55_v30  ;;  %v58_v34 = vmul.f32 %v56_v31, %v56_v31  ;;  %v54_v11 = vmul.f32 0.5, %v53_v32 }
  0x22   :  { %v48_v45 = vsel %vm23_vm2, %v47_v39, %v19_v8  ;;  %v50_v46 = vsel %vm24_vm3, %v49_v40, %v22_v9  ;;  %v52_v9 = vmul.f32 0.5, %v51_v29 }
  0x23   :  { %v59_v35 = vadd.f32 %v58_v34, %v57_v33  ;;  %v67_v49 = vadd.f32 %v50_v46, %v48_v45 }
  0x25   :  { %v60_v36 = vadd.f32 1e-08, %v59_v35  ;;  %v68_v52 = vsub.f32 %v67_v49, %v59_v35  ;;  %v83_v56 = vmul.f32 0.25, %v59_v35  ;;  %v87_v57 = vmul.f32 0.5, %v67_v49 }
  0x27   :  { %124 = vrsqrt.f32 %v60_v36  ;;  %v69_v53 = vmul.f32 0.5, %v68_v52  ;;  %v88_v62 = vsub.f32 %v87_v57, %v83_v56 }
  0x29   :  { %v70_v55 = vsub.f32 1.0, %v69_v53 }
  0x31   :  { %v125_v38 = vpop.eup %124 }
  0x32   :  { %v62_v41 = vmul.f32 %v125_v38, %v56_v31  ;;  %v64_v42 = vmul.f32 %v125_v38, %v55_v30  ;;  %v65_v54 = vmul.f32 %v125_v38, %v125_v38 }
  0x34   :  { %v63_v43 = vsub.f32 0.0, %v62_v41  ;;  %v72_v44 = vmul.f32 %v64_v42, %v42_v26  ;;  %v66_v59 = vmul.f32 %v65_v54, %v59_v35 }
  0x36   :  { %v71_v47 = vmul.f32 %v63_v43, %v40_v25 }
  0x38   :  { %v73_v48 = vadd.f32 %v72_v44, %v71_v47 }
  0x3a   :  { %vm74_vm4 = vcmp.ne.f32.partialorder %v73_v48, 0.0 }
  0x3b   :  { %v75_v50 = vsel %vm74_vm4, %v73_v48, 1.0 }
  0x3c   :  { %v76_v51 = vmul.f32 2.0, %v75_v50 }
  0x3e   :  { %126 = vrcp.f32 %v76_v51 }
  0x48   :  { %v127_v58 = vpop.eup %126 }
  0x49   :  { %v78_v60 = vmul.f32 %v127_v58, %v70_v55 }
  0x4b   :  { %v84_v61 = vmul.f32 %v78_v60, %v78_v60  ;;  %v89_v63 = vmul.f32 2.0, %v78_v60  ;;  %v79_v12 = vmul.f32 %v78_v60, %v63_v43  ;;  %v81_v14 = vmul.f32 %v78_v60, %v64_v42 }
  0x4d   :  { %v85_v0 = vmul.f32 %v84_v61, %v66_v59  ;;  %v90_v1 = vmul.f32 %v89_v63, %v73_v48  ;;  %v80_v18 = vadd.f32 %v79_v12, %v52_v9  ;;  %v82_v20 = vadd.f32 %v81_v14, %v54_v11 }
  0x4f   :  { %v86_v2 = vadd.f32 %v85_v0, %v83_v56  ;;  %v91_v3 = vadd.f32 %v90_v1, %v88_v62 }
  0x51   :  { %v92_v4 = vadd.f32 %v91_v3, %v85_v0  ;;  %v94_v5 = vadd.f32 1e-08, %v86_v2 }
  0x53   :  { %v93_v6 = vmax.f32 %v92_v4, 0.0  ;;  %128 = vrsqrt.f32 %v94_v5  ;;  %vm97_vm5 = vcmp.eq.f32.partialorder %v94_v5, inf  ;;  %v100_v10 = vand.u32 2147483648, %v94_v5 }
  0x54   :  { %vm99_vm6 = vcmp.eq.f32.partialorder %v94_v5, 0.0 }
  0x55   :  { %v102_v7 = vadd.f32 1e-08, %v93_v6 }
  0x57   :  { %130 = vrsqrt.f32 %v102_v7 }
  0x5d   :  { %v129_v8 = vpop.eup %128 }
  0x5e   :  { %v96_v13 = vmul.f32 %v129_v8, %v94_v5 }
  0x60   :  { %v98_v15 = vsel %vm97_vm5, %v94_v5, %v96_v13 }
  0x61   :  { %v131_v16 = vpop.eup %130  ;;  %v101_v17 = vsel %vm99_vm6, %v100_v10, %v98_v15 }
  0x62   :  { %v104_v19 = vmul.f32 %v131_v16, %v101_v17 }
  0x64   :  { %v105_v21 = vsub.f32 1.0, %v104_v19 }
  0x66   :  { %v106_v22 = vmul.f32 %v105_v21, %v80_v18  ;;  %v108_v23 = vmul.f32 %v105_v21, %v82_v20 }
  0x68   :  { %v107_v24 = vsel %vm74_vm4, %v106_v22, %v52_v9  ;;  %v109_v25 = vsel %vm74_vm4, %v108_v23, %v54_v11 }
  0x69   :  { %110 = vst [vmem:[%s176_s2] sm:$0xff] %v107_v24  ;;  %119 = vst [vmem:[%s176_s2 + $0x8] sm:$0xff] %v109_v25 }

</bundles_post_ra>
